<compile_context>
chip_gen: v7x
topology: tpu7x:2x2x1
jax: 0.10.0
libtpu: 0.0.40
codegen_flags: <defaults>
</compile_context>

<pallas_src>
import math
import numpy as np
import jax
import jax.numpy as jnp
from jax.experimental import pallas as pl
from jax.experimental.pallas import tpu as pltpu


# ---------------------------------------------------------------------------
# Host-side helpers
# ---------------------------------------------------------------------------
def _nearest_src_indices(out_size: int, in_size: int, scale=None) -> np.ndarray:
    """PyTorch 'nearest': src = min(floor(dst * scale), in-1), scale = 1/scale_factor
    if a scale_factor was given, else in/out.  Exact int / float64 host arithmetic
    (float32 can round off-by-one near integer boundaries)."""
    dst = np.arange(out_size, dtype=np.int64)
    if scale is None:
        src = (dst * in_size) // out_size
    else:
        src = np.floor(dst.astype(np.float64) * np.float64(scale)).astype(np.int64)
    return np.minimum(src, in_size - 1)


def _w_selection_matrix_T(src_w: np.ndarray, in_size: int, out_size: int) -> np.ndarray:
    """(in_size, out_size) one-hot matrix, pre-transposed for x @ B."""
    m = np.zeros((in_size, out_size), dtype=np.float32)
    m[src_w, np.arange(out_size)] = 1.0
    return m


def _h_selection_matrix(src_h: np.ndarray, in_size: int, out_size: int) -> np.ndarray:
    """(out_size, in_size) one-hot matrix for A @ x."""
    m = np.zeros((out_size, in_size), dtype=np.float32)
    m[np.arange(out_size), src_h] = 1.0
    return m


def _vmem_capacity_bytes() -> int:
    try:
        info = pltpu.get_tpu_info()
        cap = int(getattr(info, "vmem_capacity_bytes", 0) or 0)
        if cap > 0:
            return cap
    except Exception:
        pass
    return 128 * 1024 * 1024


_VMEM_CAP = _vmem_capacity_bytes()
# Full per-step working set (double-buffered blocks + constants):
#   v5e/v6e (128 MiB VMEM) -> 32 MiB, v7x (64 MiB VMEM) -> 24 MiB.
_VMEM_TILE_BUDGET = min(32 * 1024 * 1024, (_VMEM_CAP * 3) // 8)
# Scoped-VMEM request (raises v5e's 16 MiB default) with headroom.
_VMEM_LIMIT = min(96 * 1024 * 1024, (_VMEM_CAP * 3) // 4)


def _padded_tile_bytes(sub: int, lane: int, itemsize: int) -> int:
    """VMEM bytes of a (sub, lane) tile after (sublane, 128) tiling/padding."""
    sub_tile = max(8, 32 // max(itemsize, 1))        # f32: 8, bf16: 16, int8: 32
    psub = -(-sub // sub_tile) * sub_tile
    plane = -(-lane // 128) * 128
    return psub * plane * itemsize


# ---------------------------------------------------------------------------
# Kernels
# ---------------------------------------------------------------------------
def _upsample_int_kernel(bt_ref, x_ref, o_ref):
    # bt_ref: (W, s*W_out) one-hot W-gather matrix, column-tiled s times
    #         (folds the integer-H row replication into the same matmul).
    # x_ref : (BC, TH, W)
    # o_ref : (BC, TH, s*W_out) -- single lane-dense store per step.
    bc, th, w = x_ref.shape
    sw_out = o_ref.shape[2]
    x2 = x_ref[...].astype(bt_ref.dtype).reshape(bc * th, w)
    # TODO(synk): for very wide f32 inputs the multi-pass f32 MXU can become the
    # bottleneck; split into bf16 hi/lo planes (exact for one-hot B) if profiled.
    y = jnp.dot(x2, bt_ref[...], preferred_element_type=jnp.float32)
    o_ref[...] = y.astype(o_ref.dtype).reshape(bc, th, sw_out)


def _upsample_general_kernel(a_ref, bt_ref, x_ref, o_ref, yw_ref):
    # a_ref : (H_out, H)     one-hot H (sublane) gather
    # bt_ref: (W, W_out)     one-hot W (lane) gather, pre-transposed
    # x_ref : (BC, H, W)
    # o_ref : (BC, H_out, W_out)
    # yw_ref: (BC*H, W_out)  VMEM scratch in compute dtype
    bc, h, w = x_ref.shape
    cdt = bt_ref.dtype
    # (1) Batched W gather: ONE big-M MXU matmul for all bc images.
    yw_ref[...] = jnp.dot(
        x_ref[...].astype(cdt).reshape(bc * h, w), bt_ref[...],
        preferred_element_type=jnp.float32).astype(cdt)
    # (2) H gather per image under fori_loop (no static Python unroll).
    # TODO(synk): fuse into one matmul by presenting yw as (h, bc*w_out) once the
    # lane-merging reshape is verified to lower cleanly on all generations.
    a = a_ref[...]

    def body(b, carry):
        start = b * h
        if h % 8 == 0:
            start = pl.multiple_of(start, 8)
        y = yw_ref[pl.ds(start, h), :]
        o_ref[b] = jnp.dot(a, y, preferred_element_type=jnp.float32).astype(o_ref.dtype)
        return carry

    jax.lax.fori_loop(0, bc, body, 0)


# ---------------------------------------------------------------------------
# Wrapper
# ---------------------------------------------------------------------------
def upsample(x, size=None, scale_factor=None, mode="nearest", align_corner=None):
    """JAX/Pallas equivalent of UpSample(size, scale_factor, mode, align_corner)(x)."""
    assert mode == "nearest", "only mode='nearest' is implemented"
    assert align_corner is None, "align_corners is not valid for mode='nearest'"
    # TODO(synk): bilinear / align_corners modes need fractional-weight A/B matrices.

    n, c, h, w = x.shape
    scale_h = scale_w = None
    if size is not None:
        h_out, w_out = (size, size) if isinstance(size, int) else tuple(size)
    else:
        if isinstance(scale_factor, (tuple, list)):
            sf_h, sf_w = scale_factor
        else:
            sf_h = sf_w = scale_factor
        h_out = int(math.floor(h * sf_h))
        w_out = int(math.floor(w * sf_w))
        scale_h, scale_w = 1.0 / float(sf_h), 1.0 / float(sf_w)

    nc = n * c
    in_dt = x.dtype
    if jnp.issubdtype(in_dt, jnp.floating):
        cdt = in_dt          # one-hot matrices are exact in any float dtype
    else:
        cdt = jnp.float32    # TODO(synk): int inputs with |x| > 2^24 need a copy/gather path
    in_sz = jnp.dtype(in_dt).itemsize
    cdt_sz = jnp.dtype(cdt).itemsize

    src_h = _nearest_src_indices(h_out, h, scale_h)
    src_w = _nearest_src_indices(w_out, w, scale_w)

    x_flat = x.reshape(nc, h, w)

    use_fast = (h_out % h == 0)
    if use_fast:
        s = h_out // h
        # Replication fast path is only valid when the real index map is oh // s.
        use_fast = bool(np.array_equal(src_h, np.arange(h_out, dtype=np.int64) // s))

    if use_fast:
        # ---------------- fast path: integer H factor -----------------------
        bt_np = _w_selection_matrix_T(src_w, w, w_out)
        bt_big = jnp.asarray(np.tile(bt_np, (1, s)), dtype=cdt)      # (W, s*W_out)

        # TODO(synk): single-buffer bt_big (constant index_map) with
        # pipeline_mode=pl.Buffered(1); counted double-buffered here to be safe.
        bt_bytes = 2 * _padded_tile_bytes(w, s * w_out, cdt_sz)

        def per_img(th_):
            return 2 * (_padded_tile_bytes(th_, w, in_sz)
                        + _padded_tile_bytes(th_, s * w_out, in_sz))

        tile_budget = max(_VMEM_TILE_BUDGET - bt_bytes, per_img(min(h, 8)))

        th = h
        if per_img(h) > tile_budget and h > 8:
            th = 8
            cand = (h // 8) * 8
            while cand >= 8:
                if per_img(cand) <= tile_budget:
                    th = cand
                    break
                cand -= 8

        bc = int(max(1, min(nc, tile_budget // max(per_img(th), 1))))
        # Keep >= 2 grid steps so both v7x TensorCores get work.
        if nc >= 2 and pl.cdiv(nc, bc) * pl.cdiv(h, th) < 2:
            bc = (nc + 1) // 2

        grid = (pl.cdiv(nc, bc), pl.cdiv(h, th))
        out3 = pl.pallas_call(
            _upsample_int_kernel,
            out_shape=jax.ShapeDtypeStruct((nc, h, s * w_out), in_dt),
            grid_spec=pltpu.PrefetchScalarGridSpec(
                num_scalar_prefetch=0,
                grid=grid,
                in_specs=[
                    pl.BlockSpec((w, s * w_out), lambda i, j: (0, 0)),
                    pl.BlockSpec((bc, th, w), lambda i, j: (i, j, 0)),
                ],
                out_specs=pl.BlockSpec((bc, th, s * w_out), lambda i, j: (i, j, 0)),
            ),
            compiler_params=pltpu.CompilerParams(
                dimension_semantics=("parallel", "parallel"),
                vmem_limit_bytes=_VMEM_LIMIT,
            ),
        )(bt_big, x_flat)
        # Free row-major relabel: (nc, h, s*w_out) -> (n, c, h*s, w_out).
        return out3.reshape(n, c, h_out, w_out)

    # ---------------- general path: arbitrary size / non-integer factor -----
    a = jnp.asarray(_h_selection_matrix(src_h, h, h_out), dtype=cdt)   # (H_out, H)
    bt = jnp.asarray(_w_selection_matrix_T(src_w, w, w_out), dtype=cdt)  # (W, W_out)

    const_bytes = 2 * (_padded_tile_bytes(h_out, h, cdt_sz)
                       + _padded_tile_bytes(w, w_out, cdt_sz))
    img_bytes = (2 * (_padded_tile_bytes(h, w, in_sz)
                      + _padded_tile_bytes(h_out, w_out, in_sz))
                 + _padded_tile_bytes(h, w_out, cdt_sz))   # scratch: single-buffered
    tile_budget = max(_VMEM_TILE_BUDGET - const_bytes, img_bytes)

    bc = int(max(1, min(nc, tile_budget // max(img_bytes, 1))))
    if nc >= 2 and pl.cdiv(nc, bc) < 2:
        bc = (nc + 1) // 2

    grid = (pl.cdiv(nc, bc),)
    out = pl.pallas_call(
        _upsample_general_kernel,
        out_shape=jax.ShapeDtypeStruct((nc, h_out, w_out), in_dt),
        grid_spec=pltpu.PrefetchScalarGridSpec(
            num_scalar_prefetch=0,
            grid=grid,
            in_specs=[
                pl.BlockSpec((h_out, h), lambda i: (0, 0)),
                pl.BlockSpec((w, w_out), lambda i: (0, 0)),
                pl.BlockSpec((bc, h, w), lambda i: (i, 0, 0)),
            ],
            out_specs=pl.BlockSpec((bc, h_out, w_out), lambda i: (i, 0, 0)),
            scratch_shapes=[pltpu.VMEM((bc * h, w_out), cdt)],
        ),
        compiler_params=pltpu.CompilerParams(
            dimension_semantics=("parallel",),
            vmem_limit_bytes=_VMEM_LIMIT,
        ),
    )(a, bt, x_flat)
    return out.reshape(n, c, h_out, w_out)


# ---------------------------------------------------------------------------
if __name__ == "__main__":
    key = jax.random.PRNGKey(0)
    N, C, H, W = 2, 4, 16, 16
    x = jax.random.normal(key, (N, C, H, W), dtype=jnp.float32)
    x_np = np.asarray(x)

    def ref_nearest(arr, h_out, w_out, scale_h=None, scale_w=None):
        hh, ww = arr.shape[-2:]
        sh = _nearest_src_indices(h_out, hh, scale_h)
        sw = _nearest_src_indices(w_out, ww, scale_w)
        return arr[:, :, sh][:, :, :, sw]

    # 1) integer scale factor -> fast path (single matmul, lane-dense store)
    out = jax.block_until_ready(upsample(x, scale_factor=2, mode="nearest"))
    assert out.shape == (N, C, 2 * H, 2 * W), out.shape
    np.testing.assert_allclose(np.asarray(out),
                               ref_nearest(x_np, 2 * H, 2 * W, 0.5, 0.5),
                               rtol=1e-6, atol=1e-6)

    # 2) explicit non-multiple size -> general path (batched W matmul + fori H gather)
    out2 = jax.block_until_ready(upsample(x, size=(24, 24), mode="nearest"))
    assert out2.shape == (N, C, 24, 24), out2.shape
    np.testing.assert_allclose(np.asarray(out2), ref_nearest(x_np, 24, 24),
                               rtol=1e-6, atol=1e-6)

    print("KERNEL_OK")
</pallas_src>

<mosaic_0001>
module attributes {stable_mosaic.version = 11 : i64} {
  func.func @_upsample_int_kernel(%arg0: i32, %arg1: i32, %arg2: memref<16x64xf32, #tpu.memory_space<vmem>>, %arg3: memref<4x16x16xf32, #tpu.memory_space<vmem>>, %arg4: memref<4x16x64xf32, #tpu.memory_space<vmem>>) attributes {dimension_semantics = [#tpu.dimension_semantics<parallel>, #tpu.dimension_semantics<parallel>], iteration_bounds = array<i64: 2, 1>, scalar_prefetch = 0 : i64, scratch_operands = 0 : i64, tpu.core_type = #tpu.core_type<tc>, window_params = [{pipeline_mode = #tpu.pipeline_mode<synchronous>, transform_indices = @transform_0, window_bounds = array<i64: 16, 64>}, {transform_indices = @transform_1, window_bounds = array<i64: 4, 16, 16>}, {transform_indices = @transform_2, window_bounds = array<i64: 4, 16, 64>}]} {
    %c0 = arith.constant 0 : index
    %c0_0 = arith.constant 0 : index
    %c0_1 = arith.constant 0 : index
    %0 = vector.load %arg3[%c0, %c0_0, %c0_1] : memref<4x16x16xf32, #tpu.memory_space<vmem>>, vector<4x16x16xf32>
    %1 = vector.shape_cast %0 : vector<4x16x16xf32> to vector<64x16xf32>
    %c0_2 = arith.constant 0 : index
    %c0_3 = arith.constant 0 : index
    %2 = vector.load %arg2[%c0_2, %c0_3] : memref<16x64xf32, #tpu.memory_space<vmem>>, vector<16x64xf32>
    %cst = arith.constant dense<0.000000e+00> : vector<64x64xf32>
    %3 = tpu.matmul %1, %2, %cst {dimension_numbers = #tpu.dot_dimension_numbers<[1], [0], [0], [1], [0, 0, 1, 1], [], []>} : vector<64x16xf32>, vector<16x64xf32>, vector<64x64xf32> -> vector<64x64xf32>
    %4 = vector.shape_cast %3 : vector<64x64xf32> to vector<4x16x64xf32>
    %c0_4 = arith.constant 0 : index
    %c0_5 = arith.constant 0 : index
    %c0_6 = arith.constant 0 : index
    %5 = vector.load %arg4[%c0_4, %c0_5, %c0_6] : memref<4x16x64xf32, #tpu.memory_space<vmem>>, vector<4x16x64xf32>
    tpu.vector_store %arg4[%c0_4, %c0_5, %c0_6], %4 {strides = array<i32>} : memref<4x16x64xf32, #tpu.memory_space<vmem>>, vector<4x16x64xf32>,
    return
  }
  func.func @transform_0(%arg0: i32, %arg1: i32) -> (i32, i32) {
    %c0_i32 = arith.constant 0 : i32
    %c0_i32_0 = arith.constant 0 : i32
    %c0_i32_1 = arith.constant 0 : i32
    return %c0_i32, %c0_i32_0 : i32, i32
  }
  func.func @transform_1(%arg0: i32, %arg1: i32) -> (i32, i32, i32) {
    %c0_i32 = arith.constant 0 : i32
    %c0_i32_0 = arith.constant 0 : i32
    return %arg0, %arg1, %c0_i32 : i32, i32, i32
  }
  func.func @transform_2(%arg0: i32, %arg1: i32) -> (i32, i32, i32) {
    %c0_i32 = arith.constant 0 : i32
    %c0_i32_0 = arith.constant 0 : i32
    return %arg0, %arg1, %c0_i32 : i32, i32, i32
  }
}

</mosaic_0001>

<bundles_post_ra>
// kernel: tpu_custom_call.1
= control target key start
LH: loop header
LB: loop body
LE: loop exit
PB: predicated region body
PF: predicated region fallthrough
CT: control target
= control target key end

     0   :  { %7 = vsyncpa [#allocation3], 0  ;;  %s1014_s0 = inlined_call_operand.hbm [shape: f32[16,64], index: 0, kind: input, shape index: {}]   ;;  %s1015_s1 = inlined_call_operand.hbm [shape: f32[8,16,16], index: 1, kind: input, shape index: {}]   ;;  %s1016_s2 = inlined_call_operand.hbm [shape: f32[8,16,64], index: 2, kind: output, shape index: {}]  }
   0x1   :  { %8 = vsyncpa [#allocation6], 0 }
   0x2   :  { %10 = vsyncpa [#allocation6 + $0x1], 0 }
   0x3   :  { %11 = vsyncpa [#allocation4], 0 }
   0x4   :  { %13 = vsyncpa [#allocation4 + $0x1], 0  ;;  %s773_s9 = smov 0   ;;  %s775_s10 = smov 0  }
   0x5   :  { %s777_s11 = smov 0   ;;  %s779_s12 = smov 0  }
   0x6   :  { %s781_s13 = smov 0   ;;  %s783_s14 = smov 0  }
   0x7 LB: > { %s465_s15 = sadd.s32 4294967295, %s749_s14   ;;  %s466_s16 = sadd.s32 4294967294, %s749_s14   ;;  %s749_s14 = sphi %s783_s14, %s19_s14   ;;  %s745_s13 = sphi %s781_s13, %s1040_s13   ;;  %s741_s12 = sphi %s779_s12, %s1039_s12   ;;  %s737_s11 = sphi %s777_s11, %s1038_s11   ;;  %s733_s10 = sphi %s775_s10, %s1037_s10   ;;  %s729_s9 = sphi %s773_s9, %s1036_s9  }
   0x8   : > { %p74_p0 = scmp.ne.s32.totalorder %s733_s10, %s729_s9  ;;  %p807_p1 = scmp.eq.s32.totalorder %s465_s15, 0 }
   0x9   : > { %p811_p2 = scmp.eq.s32.totalorder %s465_s15, 1  ;;  %p106_p3 = scmp.eq.s32.totalorder %s466_s16, 1 }
   0xa   : > { %s1021_s17 = scalar_select %p807_p1, 1, 0 }
   0xb   : > { %s1022_s18 = scalar_select %p811_p2, 1, 0 }
   0xc   : > { %p817_p4 = por %p807_p1, %p74_p0  ;;  %p467_p5 = scmp.ge.s32.totalorder %s749_s14, 1 }
   0xd   : > { %p822_p6 = por %p106_p3, %p74_p0  ;;  %p113_p7 = scmp.lt.s32.totalorder %s749_s14, 3 }
   0xe   : > { %s1023_s19 = scalar_select %p817_p4, 1, 0 }
   0xf   : > { %s1024_s20 = scalar_select %p822_p6, 1, 0 }
  0x10   : > { %p827_p8 = pnand %p467_p5, %p113_p7  ;;  %s751_s22 = smov [#allocation2]  }
  0x11   : > { %s125_s23 = sshll.u32 %s751_s22, 4  ;;  %s31_s25 = sadd.s32 1, %s745_s13  ;;  %s126_s23 = int_to_ptr.vmem [resolvable:$true] %s125_s23 }
  0x12   : > { %s1025_s21 = scalar_select %p827_p8, 1, 0 }
  0x13   : > { %p536_p9 = pneg %p827_p8  ;;  %s605_s28 = scalar_lea.hbm %s1014_s0, 256 }
  0x14   : > { %p606_p12 = scmp.ne.s32.totalorder %s1014_s0, %s605_s28  ;;  %p612_p5 = scmp.lt.u32.totalorder %s605_s28, %s1014_s0 }
  0x15   : > { %p836_p11 = pnand %p536_p9, %p807_p1 }
  0x17   : > { %p607_p13 = pneg %p836_p11 }
  0x19   : > { %p608_p0 = pnand %p607_p13, %p606_p12 }
  0x1b   : > { %p609_p3 = pneg %p608_p0 }
  0x1d   : > { %p614_p7 = pnand %p612_p5, %p609_p3 }
  0x1f   : > { %617 = shalt.err (!%p614_p7)
}
  0x20   : > { %s618_s5 = scalar_lea.vmem %s126_s23, 256  ;;  %p626_p4 = scmp.lt.s32.totalorder %s126_s23, %s126_s23 }
  0x21   : > { %p619_p9 = scmp.ne.s32.totalorder %s126_s23, %s618_s5  ;;  %p627_p1 = scmp.lt.s32.totalorder %s618_s5, %s618_s5 }
  0x23   : > { %p621_p10 = pnand %p619_p9, %p607_p13  ;;  %p628_p8 = por %p627_p1, %p626_p4 }
  0x25   : > { %p622_p6 = pneg %p621_p10 }
  0x27   : > { %p629_p2 = pnand %p628_p8, %p622_p6 }
  0x29   : > { %632 = shalt.err (!%p629_p2)
}
  0x2a   : > { %s752_s6 = smov 128   ;;  %s753_s7 = smov 8  }
  0x2b   : > { %539 = dma.hbm_to_vmem [thread:$0]  (!%p836_p11), %s1014_s0, 256, %s126_s23, [#allocation3], %s752_s6, %s752_s6, %s753_s7  }
  0x2c   : > { %p33_p1 = scmp.ge.s32.totalorder %s31_s25, 2  ;;  %s61_s16 = sadd.s32 1, %s737_s11 }
  0x2d   : > { %p68_p2 = scmp.ne.s32.totalorder %s737_s11, %s733_s10  ;;  %p69_p4 = scmp.eq.s32.totalorder %s749_s14, 0 }
  0x2e   : > { %s1042_s25 = smov (%p33_p1, %s31_s25), 0  ;;  %p1028_p8 = scmp.ne.s32.totalorder %s1022_s18, 0 }
  0x2f   : > { %p866_p6 = por %p69_p4, %p68_p2  ;;  %s56_s26 = ssub.s32 %s745_s13, %s1042_s25 }
  0x30   : > { %p872_p10 = por %p1028_p8, %p68_p2  ;;  %p549_p12 = scmp.lt.s32.totalorder %s749_s14, 2 }
  0x31   : > { %p59_p11 = scmp.eq.s32.totalorder %s56_s26, 0  ;;  %s139_s23 = sand.u32 1, %s737_s11  }
  0x32   : > { %s470_s27 = sshll.u32 %s139_s23, 6  ;;  %s493_s29 = sshll.u32 %s745_s13, 10 }
  0x33   : > { %s881_s28 = scalar_select %p59_p11, %s737_s11, %s61_s16  }
  0x34   : > { %s887_s4 = scalar_lea.hbm %s1015_s1, %s493_s29  ;;  %s143_s18 = scalar_lea.vmem [#allocation5], %s470_s27 }
  0x35   : > { %s153_s5 = sshll.u32 %s143_s18, 4  ;;  %p893_p13 = pnand %p549_p12, %p866_p6  ;;  %s889_s5 = int_to_ptr.vmem [resolvable:$true] %s153_s5 }
  0x36   : > { %s897_s15 = scalar_lea.sflag [#allocation6], %s139_s23  ;;  %s633_s16 = scalar_lea.hbm %s887_s4, 1024 }
  0x37   : > { %p634_p0 = scmp.ne.s32.totalorder %s887_s4, %s633_s16  ;;  %p635_p3 = pneg %p893_p13 }
  0x38   : > { %s638_s22 = scalar_lea.hbm %s1015_s1, 2048  ;;  %p639_p9 = scmp.lt.u32.totalorder %s887_s4, %s1015_s1 }
  0x39   : > { %p636_p5 = pnand %p635_p3, %p634_p0  ;;  %p640_p1 = scmp.lt.u32.totalorder %s638_s22, %s633_s16 }
  0x3a   : > { %p642_p4 = scmp.lt.u32.totalorder %s633_s16, %s887_s4 }
  0x3b   : > { %p637_p7 = pneg %p636_p5  ;;  %p641_p2 = por %p640_p1, %p639_p9 }
  0x3d   : > { %p643_p6 = por %p642_p4, %p641_p2 }
  0x3f   : > { %p644_p8 = pnand %p643_p6, %p637_p7 }
  0x41   : > { %647 = shalt.err (!%p644_p8)
}
  0x42   : > { %s648_s23 = scalar_lea.vmem %s889_s5, 1024  ;;  %s754_s3 = smov [#allocation5]  }
  0x43   : > { %p649_p12 = scmp.ne.s32.totalorder %s889_s5, %s648_s23  ;;  %s653_s18 = sshll.u32 %s754_s3, 4  ;;  %s654_s18 = int_to_ptr.vmem [resolvable:$false] %s653_s18 }
  0x44   : > { %s655_s26 = scalar_lea.vmem %s654_s18, 2048  ;;  %p656_p5 = scmp.lt.s32.totalorder %s889_s5, %s654_s18 }
  0x45   : > { %p651_p11 = pnand %p649_p12, %p635_p3  ;;  %p657_p9 = scmp.lt.s32.totalorder %s655_s26, %s648_s23 }
  0x47   : > { %p652_p0 = pneg %p651_p11  ;;  %p658_p1 = por %p657_p9, %p656_p5 }
  0x49   : > { %p659_p2 = pnand %p658_p1, %p652_p0 }
  0x4b   : > { %662 = shalt.err (!%p659_p2)
}
  0x4c   : > { %543 = dma.hbm_to_vmem [thread:$0]  (!%p893_p13), %s887_s4, 1024, %s889_s5, %s897_s15, %s752_s6, %s752_s6, %s753_s7  }
  0x4d   : > { %p1031_p3 = scmp.ne.s32.totalorder %s1025_s21, 0 }
  0x4e   : > { %p1032_p7 = scmp.ne.s32.totalorder (!%p1031_p3), %s1021_s17, 0 }
  0x4f   : > { %165 = sbr.rel (%p1031_p3) target bundleno = 331 (0x14b), region = 28 }
  0x56   : > { %716 = dma.done.wait (%p1032_p7), [#allocation3], 256  }
  0x57   : > { %718 = vsyncadd (%p1032_p7), [#allocation3], 4294967040  ;;  %s935_s16 = sand.u32 1, %s733_s10   ;;  %p1033_p4 = scmp.ne.s32.totalorder %s1023_s19, 0 }
  0x58   : > { %s476_s8 = sshll.u32 %s935_s16, 6  ;;  %s172_s27 = scalar_lea.sflag [#allocation6], %s935_s16 }
  0x59   : > { %s175_s22 = scalar_lea.vmem [#allocation5], %s476_s8 }
  0x5a   : > { %720 = dma.done.wait (%p1033_p4), %s172_s27, 1024  }
  0x5b   : > { %722 = vsyncadd (%p1033_p4), %s172_s27, 4294966272  ;;  %vm210_vm0 = vcmask 130048   ;;  %v208_v0 = vld [vmem:[#allocation2] sm:$0xff]  ;;  %v209_v1 = vld [vmem:[#allocation2 + $0x8] sm:$0xff]  ;;  %vm340_vm1 = vcmask 523264   ;;  %s195_s17 = scalar_lea.vmem [#allocation7], %s476_s8 }
  0x5c   : > { %v200_v2 = vld [vmem:[%s175_s22] sm:$0xff]  ;;  %v522_v3 = vpack.c.bf16 %v209_v1, %v208_v0  ;;  %v201_v5 = vld [vmem:[%s175_s22 + $0x8] sm:$0xff]  ;;  %v202_v7 = vld [vmem:[%s175_s22 + $0x10] sm:$0xff]  ;;  %s366_s19 = sshll.u32 %s195_s17, 4  ;;  %s495_s21 = sshll.u32 %s741_s12, 10  ;;  %s954_s19 = int_to_ptr.vmem [resolvable:$true] %s366_s19 }
  0x5d   : > { %510 = vmatprep.mubr.msk.f32.mxu0 %vm210_vm0, %v200_v2  ;;  %v204_v4 = vld [vmem:[%s175_s22 + $0x20] sm:$0xff]  ;;  %v205_v6 = vld [vmem:[%s175_s22 + $0x28] sm:$0xff]  ;;  %v206_v8 = vld [vmem:[%s175_s22 + $0x30] sm:$0xff]  ;;  %s961_s12 = scalar_lea.hbm %s1016_s2, %s495_s21  ;;  %s350_s4 = scalar_lea.sflag [#allocation4], %s935_s16 }
  0x5e   : > { %516 = vmatprep.mubr.msk.f32.mxu1 %vm210_vm0, %v204_v4  ;;  %523 = vmatprep.subr.bf16.mxu0 %v522_v3  ;;  %v203_v9 = vld [vmem:[%s175_s22 + $0x18] sm:$0xff]  ;;  %s663_s5 = scalar_lea.vmem %s954_s19, 1024  ;;  %s755_s15 = smov [#allocation7]  }
  0x5f   : > { %526 = vmatprep.subr.bf16.mxu1 %v522_v3  ;;  %525 = vmatpush3.bf16.msra.mxu0 %v522_v3  ;;  %v207_v10 = vld [vmem:[%s175_s22 + $0x38] sm:$0xff]  ;;  %p664_p13 = scmp.ne.s32.totalorder %s954_s19, %s663_s5  ;;  %s667_s29 = sshll.u32 %s755_s15, 4  ;;  %s668_s29 = int_to_ptr.vmem [resolvable:$false] %s667_s29 }
  0x60   : > { %527 = vmatpush3.bf16.msra.mxu1 %v522_v3  ;;  %s669_s30 = scalar_lea.vmem %s668_s29, 2048  ;;  %p670_p12 = scmp.lt.s32.totalorder %s954_s19, %s668_s29 }
  0x61   : > { %p665_p6 = pnand %p664_p13, %p872_p10  ;;  %p671_p11 = scmp.lt.s32.totalorder %s669_s30, %s663_s5 }
  0x62   : > { %511 = vmatmul.mubr.msk.f32.vlgmr.msra.gmra.mrb[0].mxu0 %vm210_vm0, %v201_v5 }
  0x63   : > { %517 = vmatmul.mubr.msk.f32.vlgmr.msra.gmra.mrb[0].mxu1 %vm210_vm0, %v205_v6  ;;  %513 = vmatprep.mubr.msk.f32.mxu0 %vm210_vm0, %v202_v7  ;;  %p666_p8 = pneg %p665_p6  ;;  %p672_p0 = por %p671_p11, %p670_p12 }
  0x64   : > { %519 = vmatprep.mubr.msk.f32.mxu1 %vm210_vm0, %v206_v8 }
  0x65   : > { %p673_p5 = pnand %p672_p0, %p666_p8 }
  0x66   : > { %514 = vmatmul.mubr.msk.f32.gmra.mrb[2].mxu0 %vm210_vm0, %v203_v9 }
  0x67   : > { %520 = vmatmul.mubr.msk.f32.gmra.mrb[2].mxu1 %vm210_vm0, %v207_v10 }
 0x135   : > { %v512_v11 = vpop.f32.mrb[0].mxu0 }
 0x136   : > { %v518_v12 = vpop.f32.mrb[0].mxu1  ;;  %342 = vst.msk [vmem:[%s195_s17 + $0x8] sm:$0xff] %vm340_vm1, %v512_v11  ;;  %v301_v13 = vpop.f32.mrb[1].mxu0 }
 0x137   : > { %346 = vst.msk [vmem:[%s195_s17 + $0x28] sm:$0xff] %vm340_vm1, %v518_v12  ;;  %v321_v14 = vpop.f32.mrb[1].mxu1  ;;  %341 = vst.msk [vmem:[%s195_s17] sm:$0xff] %vm340_vm1, %v301_v13 }
 0x138   : > { %345 = vst.msk [vmem:[%s195_s17 + $0x20] sm:$0xff] %vm340_vm1, %v321_v14 }
 0x139   : > { %v515_v15 = vpop.f32.mrb[2].mxu0 }
 0x13a   : > { %v521_v16 = vpop.f32.mrb[2].mxu1  ;;  %344 = vst.msk [vmem:[%s195_s17 + $0x18] sm:$0xff] %vm340_vm1, %v515_v15  ;;  %v311_v17 = vpop.f32.mrb[3].mxu0 }
 0x13b   : > { %348 = vst.msk [vmem:[%s195_s17 + $0x38] sm:$0xff] %vm340_vm1, %v521_v16  ;;  %v331_v18 = vpop.f32.mrb[3].mxu1  ;;  %343 = vst.msk [vmem:[%s195_s17 + $0x10] sm:$0xff] %vm340_vm1, %v311_v17 }
 0x13c   : > { %347 = vst.msk [vmem:[%s195_s17 + $0x30] sm:$0xff] %vm340_vm1, %v331_v18 }
 0x13d   : > { %676 = shalt.err (!%p673_p5)
}
 0x13e   : > { %s677_s23 = scalar_lea.hbm %s961_s12, 1024  ;;  %s681_s26 = scalar_lea.hbm %s1016_s2, 2048 }
 0x13f   : > { %p678_p9 = scmp.ne.s32.totalorder %s961_s12, %s677_s23  ;;  %p682_p3 = scmp.lt.u32.totalorder %s961_s12, %s1016_s2 }
 0x140   : > { %p683_p7 = scmp.lt.u32.totalorder %s681_s26, %s677_s23  ;;  %p685_p13 = scmp.lt.u32.totalorder %s677_s23, %s961_s12 }
 0x141   : > { %p679_p1 = pnand %p678_p9, %p872_p10 }
 0x142   : > { %p684_p4 = por %p683_p7, %p682_p3 }
 0x143   : > { %p680_p2 = pneg %p679_p1 }
 0x144   : > { %p686_p6 = por %p685_p13, %p684_p4 }
 0x146   : > { %p687_p8 = pnand %p686_p6, %p680_p2 }
 0x148   : > { %690 = shalt.err (!%p687_p8)
}
 0x149   : > { %s756_s22 = smov 128   ;;  %s757_s17 = smov 8  }
 0x14a   : > { %534 = dma.vmem_to_hbm [thread:$0]  (%p872_p10), %s954_s19, 1024, %s961_s12, %s350_s4, %s756_s22, %s756_s22, %s757_s17  }
 0x14b PF: > { %s381_s21 = sand.u32 1, %s729_s9   ;;  %p1034_p12 = scmp.ne.s32.totalorder %s1024_s20, 0 }
 0x14c   : > { %p1035_p11 = scmp.ge.s32.totalorder %s749_s14, 2  ;;  %s382_s6 = scalar_lea.sflag [#allocation4], %s381_s21 }
 0x14e   : > { %p545_p0 = pnand %p1035_p11, %p1034_p12 }
 0x150   : > { %724 = dma.done.wait (!%p545_p0), %s382_s6, 1024  }
 0x151   : > { %726 = vsyncadd (!%p545_p0), %s382_s6, 4294966272  ;;  %s19_s14 = sadd.s32 1, %s749_s14   ;;  %s1036_s9 = smov %s733_s10 }
 0x152   : > { %p16_p5 = scmp.ge.s32.totalorder %s19_s14, 4   ;;  %s1037_s10 = smov %s737_s11 }
 0x153   : > { %s1038_s11 = smov %s881_s28  ;;  %s1039_s12 = smov %s745_s13 }
 0x154   : > { %s1040_s13 = smov %s1042_s25  ;;  %18 = sbr.rel (!%p16_p5) target bundleno = 7 (0x7), region = 78 }
 0x15b   :  { %387 = vsyncpa [#allocation3], 1 }
 0x15c   :  { %389 = vsyncpa [#allocation3 + $0x1], 1 }
 0x15d   :  { %390 = vsyncpa [#allocation6], 1 }
 0x15e   :  { %392 = vsyncpa [#allocation6 + $0x1], 1 }
 0x15f   :  { %393 = vsyncpa [#allocation4], 1 }
 0x160   :  { %395 = vsyncpa [#allocation4 + $0x1], 1 }

</bundles_post_ra>
